<compile_context>
chip_gen: v5e
topology: v5e:2x2
jax: 0.10.0
libtpu: 0.0.40
codegen_flags: <defaults>
</compile_context>

<pallas_src>
import functools

import numpy as np

import jax
import jax.numpy as jnp
from jax.experimental import pallas as pl
from jax.experimental.pallas import tpu as pltpu

LEAKY_SLOPE = 0.01   # nn.LeakyReLU default negative_slope
BN_EPS = 1e-5        # nn.BatchNorm2d default eps


# --------------------------------------------------------------------------------------
# Kernel
# --------------------------------------------------------------------------------------
def _double_conv_kernel(x_ref, b1_ref, s1_ref, b2_ref, s2_ref, out_ref, *, d1, d2, H):
    """Fused DoubleConv for a block of B_TILE images.

    x_ref  : (B_TILE, H, W*Cin)        activations, W and Cin folded onto lanes
    b1_ref : (W*Cin, 3*W*C1)  bf16     banded weights, ky bands [up | mid | dn] concat along N
    s1_ref : (1, W*C1)        f32      folded conv-bias + BN shift
    b2_ref : (W*C1,  3*W*C1)  bf16
    s2_ref : (1, W*C1)        f32
    out_ref: (B_TILE, H, W*C1)         (W*C1 = 128 -> lane-dense output)
    """
    BT, _, WCin = x_ref.shape
    WC1 = out_ref.shape[2]
    M = BT * H

    # (B_TILE, H, W*Cin) -> (B_TILE*H, W*Cin): fold batch+height onto the matmul M axis.
    x = x_ref[...].reshape(M, WCin)

    # Per-image row index, built ONCE and shared by both stages (JAX does not CSE
    # broadcast_in_dim).  Building the iota with a (B_TILE, H, ...) shape makes the halo
    # masks per-image, so rolled contributions never leak across image boundaries.
    rows = jax.lax.broadcasted_iota(jnp.int32, (BT, H, WC1), 1).reshape(M, WC1)

    def stage(x_act, band_ref, shift_ref, d):
        # 0/1 row masks == vertical zero padding at each image's top/bottom edge.
        up_ok = (rows >= d).astype(jnp.float32)
        dn_ok = (rows < H - d).astype(jnp.float32)
        # Single MXU pass per stage: K = W*Cin, N = 3*W*Cout (= 384); bf16 operands,
        # f32 accumulation.
        acc3 = jnp.dot(x_act.astype(jnp.bfloat16), band_ref[...],
                       preferred_element_type=jnp.float32)            # (M, 3*WC1)
        up = pltpu.roll(acc3[:, :WC1], shift=d, axis=0)                # out row r <- in row r-d
        mid = acc3[:, WC1:2 * WC1]                                     # out row r <- in row r
        dn = pltpu.roll(acc3[:, 2 * WC1:], shift=M - d, axis=0)        # out row r <- in row r+d
        y = mid + up_ok * up + dn_ok * dn + shift_ref[...]             # folded bias + BN (eval)
        return jnp.where(y >= 0, y, LEAKY_SLOPE * y)                   # LeakyReLU

    y1 = stage(x, b1_ref, s1_ref, d1)     # stage-1 activation never leaves VMEM
    # Dropout2d(p=0.1): identity in eval mode.
    y2 = stage(y1, b2_ref, s2_ref, d2)
    # Dropout2d(p=0.1): identity in eval mode.
    out_ref[...] = y2.reshape(BT, H, WC1).astype(out_ref.dtype)


# --------------------------------------------------------------------------------------
# Wrapper
# --------------------------------------------------------------------------------------
def _pick_batch_tile(N, H, target_rows=256):
    """B_TILE such that B_TILE*H ~ target matmul-M, N % B_TILE == 0, and (when N allows)
    at least 2 grid steps remain so both v7x TensorCores get work."""
    bt = max(1, min(N, max(1, target_rows // max(H, 1))))
    if N >= 2:
        bt = max(1, min(bt, N // 2))
    while N % bt:
        bt -= 1
    return bt


@jax.jit
def double_conv_forward_folded(x_folded, params):
    """Hot-path entry point: input/output stay in the lane-folded (N, H, W*C) layout."""
    N, H, WCin = x_folded.shape
    WC1 = params["s1"].shape[1]
    BT = _pick_batch_tile(N, H)

    kern = functools.partial(_double_conv_kernel, d1=2, d2=1, H=H)
    return pl.pallas_call(
        kern,
        out_shape=jax.ShapeDtypeStruct((N, H, WC1), jnp.float32),
        grid=(N // BT,),
        in_specs=[
            pl.BlockSpec((BT, H, WCin), lambda n: (n, 0, 0)),
            pl.BlockSpec(params["b1"].shape, lambda n: (0, 0)),   # grid-invariant weights
            pl.BlockSpec(params["s1"].shape, lambda n: (0, 0)),
            pl.BlockSpec(params["b2"].shape, lambda n: (0, 0)),
            pl.BlockSpec(params["s2"].shape, lambda n: (0, 0)),
        ],
        out_specs=pl.BlockSpec((BT, H, WC1), lambda n: (n, 0, 0)),
        compiler_params=pltpu.CompilerParams(
            dimension_semantics=("parallel",),
            vmem_limit_bytes=32 * 1024 * 1024),
    )(x_folded, params["b1"], params["s1"], params["b2"], params["s2"])


@jax.jit
def double_conv_forward(x_nchw, params):
    """PyTorch-parity NCHW wrapper.  The layout transposes live here, outside the kernel;
    chained blocks should use double_conv_forward_folded and skip them entirely."""
    N, Cin, H, W = x_nchw.shape
    C1 = params["s1"].shape[1] // W
    x = jnp.transpose(x_nchw, (0, 2, 3, 1)).reshape(N, H, W * Cin)
    out = double_conv_forward_folded(x, params)
    return jnp.transpose(out.reshape(N, H, W, C1), (0, 3, 1, 2))


# --------------------------------------------------------------------------------------
# Parameter prep: PyTorch-layout raw params -> folded, banded kernel params (host side)
# --------------------------------------------------------------------------------------
def init_params(key, in_channels, out_channels):
    """Deterministic synthetic raw parameters in PyTorch layouts."""
    ks = jax.random.split(key, 12)

    def conv_w(k, cin, cout):
        return 0.1 * jax.random.normal(k, (cout, cin, 3, 3), jnp.float32)  # (Cout,Cin,KH,KW)

    def bn(kg, kb, km, kv, c):
        gamma = 1.0 + 0.1 * jax.random.normal(kg, (c,), jnp.float32)
        beta = 0.1 * jax.random.normal(kb, (c,), jnp.float32)
        mean = 0.1 * jax.random.normal(km, (c,), jnp.float32)
        var = 0.5 + jnp.abs(jax.random.normal(kv, (c,), jnp.float32))
        return gamma, beta, mean, var

    g1, be1, m1, v1 = bn(ks[2], ks[3], ks[4], ks[5], out_channels)
    g2, be2, m2, v2 = bn(ks[8], ks[9], ks[10], ks[11], out_channels)
    return {
        "w1": conv_w(ks[0], in_channels, out_channels),
        "b1": 0.1 * jax.random.normal(ks[1], (out_channels,), jnp.float32),
        "gamma1": g1, "beta1": be1, "mean1": m1, "var1": v1,
        "w2": conv_w(ks[6], out_channels, out_channels),
        "b2": 0.1 * jax.random.normal(ks[7], (out_channels,), jnp.float32),
        "gamma2": g2, "beta2": be2, "mean2": m2, "var2": v2,
    }


def prepare_params(raw, W):
    """Fold conv bias + BatchNorm(eval) into weights/shift, build N-concatenated banded
    bf16 matmul weights (horizontal zero-padding baked in)."""
    f = lambda a: np.asarray(a, dtype=np.float32)

    def fold(w, b, gamma, beta, mean, var):
        scale = f(gamma) / np.sqrt(f(var) + BN_EPS)
        wf = np.transpose(f(w), (2, 3, 1, 0)) * scale[None, None, None, :]  # (KH,KW,Cin,Cout)
        shift = f(b) * scale + (f(beta) - f(mean) * scale)                  # (Cout,)
        return wf, shift

    def banded(wf, d):
        # B[ky][jin*Cin + c, j*Cout + o] = wf[ky, kx, c, o]  where jin = j + (kx-1)*d;
        # entries with jin outside [0, W) are omitted == horizontal zero padding.
        K, _, cin, cout = wf.shape
        B = np.zeros((K, W * cin, W * cout), np.float32)
        for ky in range(K):
            for kx in range(K):
                for j in range(W):
                    jin = j + (kx - K // 2) * d
                    if 0 <= jin < W:
                        B[ky, jin * cin:(jin + 1) * cin, j * cout:(j + 1) * cout] = wf[ky, kx]
        # Concatenate the 3 ky bands along N ([up | mid | dn]) -> ONE (W*cin, 3*W*cout)
        # matmul per stage: fully occupies the 256-wide MXU on v6e/v7x.  Stored bf16.
        return jnp.asarray(np.concatenate([B[0], B[1], B[2]], axis=1)).astype(jnp.bfloat16)

    w1f, sh1 = fold(raw["w1"], raw["b1"], raw["gamma1"], raw["beta1"], raw["mean1"], raw["var1"])
    w2f, sh2 = fold(raw["w2"], raw["b2"], raw["gamma2"], raw["beta2"], raw["mean2"], raw["var2"])
    return {
        "b1": banded(w1f, 2),
        "s1": jnp.asarray(np.tile(sh1, W))[None, :].astype(jnp.float32),
        "b2": banded(w2f, 1),
        "s2": jnp.asarray(np.tile(sh2, W))[None, :].astype(jnp.float32),
    }


# --------------------------------------------------------------------------------------
# Pure-JAX reference (eval-mode PyTorch semantics) for correctness checking
# --------------------------------------------------------------------------------------
def _reference_forward(x_nchw, raw):
    def stage(x, w, b, gamma, beta, mean, var, d):
        y = jax.lax.conv_general_dilated(
            x, w, window_strides=(1, 1), padding=((d, d), (d, d)), rhs_dilation=(d, d),
            dimension_numbers=("NCHW", "OIHW", "NCHW"), precision=jax.lax.Precision.HIGHEST)
        scale = gamma / jnp.sqrt(var + BN_EPS)
        shift = b * scale + (beta - mean * scale)
        y = y * scale[None, :, None, None] + shift[None, :, None, None]
        return jnp.where(y >= 0, y, LEAKY_SLOPE * y)

    y = stage(x_nchw, raw["w1"], raw["b1"], raw["gamma1"], raw["beta1"], raw["mean1"], raw["var1"], 2)
    y = stage(y, raw["w2"], raw["b2"], raw["gamma2"], raw["beta2"], raw["mean2"], raw["var2"], 1)
    return y


if __name__ == "__main__":
    in_channels, out_channels = 4, 8
    N, H, W = 2, 16, 16
    key = jax.random.PRNGKey(0)
    kx, kp = jax.random.split(key)

    x = jax.random.normal(kx, (N, in_channels, H, W), jnp.float32)  # NCHW, like PyTorch
    raw = init_params(kp, in_channels, out_channels)
    params = prepare_params(raw, W)

    out = jax.block_until_ready(double_conv_forward(x, params))
    assert out.shape == (N, out_channels, H, W), out.shape

    ref = jax.block_until_ready(_reference_forward(x, raw))
    np.testing.assert_allclose(np.asarray(out), np.asarray(ref), rtol=4e-2, atol=4e-2)
    print("KERNEL_OK")
</pallas_src>

<mosaic_0001>
module attributes {stable_mosaic.version = 11 : i64} {
  func.func @_double_conv_kernel(%arg0: i32, %arg1: memref<1x16x64xf32, #tpu.memory_space<vmem>>, %arg2: memref<64x384xbf16, #tpu.memory_space<vmem>>, %arg3: memref<1x128xf32, #tpu.memory_space<vmem>>, %arg4: memref<128x384xbf16, #tpu.memory_space<vmem>>, %arg5: memref<1x128xf32, #tpu.memory_space<vmem>>, %arg6: memref<1x16x128xf32, #tpu.memory_space<vmem>>) attributes {dimension_semantics = [#tpu.dimension_semantics<parallel>], iteration_bounds = array<i64: 2>, scalar_prefetch = 0 : i64, scratch_operands = 0 : i64, tpu.core_type = #tpu.core_type<tc>, window_params = [{transform_indices = @transform_0, window_bounds = array<i64: 1, 16, 64>}, {pipeline_mode = #tpu.pipeline_mode<synchronous>, transform_indices = @transform_1, window_bounds = array<i64: 64, 384>}, {pipeline_mode = #tpu.pipeline_mode<synchronous>, transform_indices = @transform_2, window_bounds = array<i64: 1, 128>}, {pipeline_mode = #tpu.pipeline_mode<synchronous>, transform_indices = @transform_3, window_bounds = array<i64: 128, 384>}, {pipeline_mode = #tpu.pipeline_mode<synchronous>, transform_indices = @transform_4, window_bounds = array<i64: 1, 128>}, {transform_indices = @transform_5, window_bounds = array<i64: 1, 16, 128>}]} {
    %c0 = arith.constant 0 : index
    %c0_0 = arith.constant 0 : index
    %c0_1 = arith.constant 0 : index
    %0 = vector.load %arg1[%c0, %c0_0, %c0_1] : memref<1x16x64xf32, #tpu.memory_space<vmem>>, vector<1x16x64xf32>
    %1 = vector.shape_cast %0 : vector<1x16x64xf32> to vector<16x64xf32>
    %2 = tpu.iota {dimensions = array<i32: 1>} : vector<1x16x128xi32>
    %3 = vector.shape_cast %2 : vector<1x16x128xi32> to vector<16x128xi32>
    %c2_i32 = arith.constant 2 : i32
    %4 = vector.broadcast %c2_i32 : i32 to vector<16x128xi32>
    %5 = arith.cmpi sge, %3, %4 : vector<16x128xi32>
    %6 = arith.extui %5 : vector<16x128xi1> to vector<16x128xi32>
    %7 = arith.sitofp %6 : vector<16x128xi32> to vector<16x128xf32>
    %c14_i32 = arith.constant 14 : i32
    %8 = vector.broadcast %c14_i32 : i32 to vector<16x128xi32>
    %9 = arith.cmpi slt, %3, %8 : vector<16x128xi32>
    %10 = arith.extui %9 : vector<16x128xi1> to vector<16x128xi32>
    %11 = arith.sitofp %10 : vector<16x128xi32> to vector<16x128xf32>
    %12 = arith.truncf %1 : vector<16x64xf32> to vector<16x64xbf16>
    %c0_2 = arith.constant 0 : index
    %c0_3 = arith.constant 0 : index
    %13 = vector.load %arg2[%c0_2, %c0_3] : memref<64x384xbf16, #tpu.memory_space<vmem>>, vector<64x384xbf16>
    %cst = arith.constant dense<0.000000e+00> : vector<16x384xf32>
    %14 = tpu.matmul %12, %13, %cst {dimension_numbers = #tpu.dot_dimension_numbers<[1], [0], [0], [1], [0, 0, 1, 1], [], []>} : vector<16x64xbf16>, vector<64x384xbf16>, vector<16x384xf32> -> vector<16x384xf32>
    %15 = vector.extract_strided_slice %14 {offsets = [0, 0], sizes = [16, 128], strides = [1, 1]} : vector<16x384xf32> to vector<16x128xf32>
    %c2_i32_4 = arith.constant 2 : i32
    %16 = tpu.dynamic_rotate %15 by %c2_i32_4 dim 0 : vector<16x128xf32>, i32 -> vector<16x128xf32>
    %17 = vector.extract_strided_slice %14 {offsets = [0, 128], sizes = [16, 128], strides = [1, 1]} : vector<16x384xf32> to vector<16x128xf32>
    %18 = vector.extract_strided_slice %14 {offsets = [0, 256], sizes = [16, 128], strides = [1, 1]} : vector<16x384xf32> to vector<16x128xf32>
    %c14_i32_5 = arith.constant 14 : i32
    %19 = tpu.dynamic_rotate %18 by %c14_i32_5 dim 0 : vector<16x128xf32>, i32 -> vector<16x128xf32>
    %20 = arith.mulf %7, %16 : vector<16x128xf32>
    %21 = arith.addf %17, %20 : vector<16x128xf32>
    %22 = arith.mulf %11, %19 : vector<16x128xf32>
    %23 = arith.addf %21, %22 : vector<16x128xf32>
    %c0_6 = arith.constant 0 : index
    %c0_7 = arith.constant 0 : index
    %24 = vector.load %arg3[%c0_6, %c0_7] : memref<1x128xf32, #tpu.memory_space<vmem>>, vector<1x128xf32>
    %25 = vector.broadcast %24 : vector<1x128xf32> to vector<16x128xf32>
    %26 = arith.addf %23, %25 : vector<16x128xf32>
    %cst_8 = arith.constant 0.000000e+00 : f32
    %27 = vector.broadcast %cst_8 : f32 to vector<16x128xf32>
    %28 = arith.cmpf oge, %26, %27 : vector<16x128xf32>
    %cst_9 = arith.constant 0.00999999977 : f32
    %29 = vector.broadcast %cst_9 : f32 to vector<16x128xf32>
    %30 = arith.mulf %29, %26 : vector<16x128xf32>
    %31 = arith.select %28, %26, %30 : vector<16x128xi1>, vector<16x128xf32>
    %c1_i32 = arith.constant 1 : i32
    %32 = vector.broadcast %c1_i32 : i32 to vector<16x128xi32>
    %33 = arith.cmpi sge, %3, %32 : vector<16x128xi32>
    %34 = arith.extui %33 : vector<16x128xi1> to vector<16x128xi32>
    %35 = arith.sitofp %34 : vector<16x128xi32> to vector<16x128xf32>
    %c15_i32 = arith.constant 15 : i32
    %36 = vector.broadcast %c15_i32 : i32 to vector<16x128xi32>
    %37 = arith.cmpi slt, %3, %36 : vector<16x128xi32>
    %38 = arith.extui %37 : vector<16x128xi1> to vector<16x128xi32>
    %39 = arith.sitofp %38 : vector<16x128xi32> to vector<16x128xf32>
    %40 = arith.truncf %31 : vector<16x128xf32> to vector<16x128xbf16>
    %c0_10 = arith.constant 0 : index
    %c0_11 = arith.constant 0 : index
    %41 = vector.load %arg4[%c0_10, %c0_11] : memref<128x384xbf16, #tpu.memory_space<vmem>>, vector<128x384xbf16>
    %cst_12 = arith.constant dense<0.000000e+00> : vector<16x384xf32>
    %42 = tpu.matmul %40, %41, %cst_12 {dimension_numbers = #tpu.dot_dimension_numbers<[1], [0], [0], [1], [0, 0, 1, 1], [], []>} : vector<16x128xbf16>, vector<128x384xbf16>, vector<16x384xf32> -> vector<16x384xf32>
    %43 = vector.extract_strided_slice %42 {offsets = [0, 0], sizes = [16, 128], strides = [1, 1]} : vector<16x384xf32> to vector<16x128xf32>
    %c1_i32_13 = arith.constant 1 : i32
    %44 = tpu.dynamic_rotate %43 by %c1_i32_13 dim 0 : vector<16x128xf32>, i32 -> vector<16x128xf32>
    %45 = vector.extract_strided_slice %42 {offsets = [0, 128], sizes = [16, 128], strides = [1, 1]} : vector<16x384xf32> to vector<16x128xf32>
    %46 = vector.extract_strided_slice %42 {offsets = [0, 256], sizes = [16, 128], strides = [1, 1]} : vector<16x384xf32> to vector<16x128xf32>
    %c15_i32_14 = arith.constant 15 : i32
    %47 = tpu.dynamic_rotate %46 by %c15_i32_14 dim 0 : vector<16x128xf32>, i32 -> vector<16x128xf32>
    %48 = arith.mulf %35, %44 : vector<16x128xf32>
    %49 = arith.addf %45, %48 : vector<16x128xf32>
    %50 = arith.mulf %39, %47 : vector<16x128xf32>
    %51 = arith.addf %49, %50 : vector<16x128xf32>
    %c0_15 = arith.constant 0 : index
    %c0_16 = arith.constant 0 : index
    %52 = vector.load %arg5[%c0_15, %c0_16] : memref<1x128xf32, #tpu.memory_space<vmem>>, vector<1x128xf32>
    %53 = vector.broadcast %52 : vector<1x128xf32> to vector<16x128xf32>
    %54 = arith.addf %51, %53 : vector<16x128xf32>
    %cst_17 = arith.constant 0.000000e+00 : f32
    %55 = vector.broadcast %cst_17 : f32 to vector<16x128xf32>
    %56 = arith.cmpf oge, %54, %55 : vector<16x128xf32>
    %cst_18 = arith.constant 0.00999999977 : f32
    %57 = vector.broadcast %cst_18 : f32 to vector<16x128xf32>
    %58 = arith.mulf %57, %54 : vector<16x128xf32>
    %59 = arith.select %56, %54, %58 : vector<16x128xi1>, vector<16x128xf32>
    %60 = vector.shape_cast %59 : vector<16x128xf32> to vector<1x16x128xf32>
    %c0_19 = arith.constant 0 : index
    %c0_20 = arith.constant 0 : index
    %c0_21 = arith.constant 0 : index
    %61 = vector.load %arg6[%c0_19, %c0_20, %c0_21] : memref<1x16x128xf32, #tpu.memory_space<vmem>>, vector<1x16x128xf32>
    tpu.vector_store %arg6[%c0_19, %c0_20, %c0_21], %60 {strides = array<i32>} : memref<1x16x128xf32, #tpu.memory_space<vmem>>, vector<1x16x128xf32>,
    return
  }
  func.func @transform_0(%arg0: i32) -> (i32, i32, i32) {
    %c0_i32 = arith.constant 0 : i32
    %c0_i32_0 = arith.constant 0 : i32
    %c0_i32_1 = arith.constant 0 : i32
    return %arg0, %c0_i32, %c0_i32_0 : i32, i32, i32
  }
  func.func @transform_1(%arg0: i32) -> (i32, i32) {
    %c0_i32 = arith.constant 0 : i32
    %c0_i32_0 = arith.constant 0 : i32
    %c0_i32_1 = arith.constant 0 : i32
    return %c0_i32, %c0_i32_0 : i32, i32
  }
  func.func @transform_2(%arg0: i32) -> (i32, i32) {
    %c0_i32 = arith.constant 0 : i32
    %c0_i32_0 = arith.constant 0 : i32
    %c0_i32_1 = arith.constant 0 : i32
    return %c0_i32, %c0_i32_0 : i32, i32
  }
  func.func @transform_3(%arg0: i32) -> (i32, i32) {
    %c0_i32 = arith.constant 0 : i32
    %c0_i32_0 = arith.constant 0 : i32
    %c0_i32_1 = arith.constant 0 : i32
    return %c0_i32, %c0_i32_0 : i32, i32
  }
  func.func @transform_4(%arg0: i32) -> (i32, i32) {
    %c0_i32 = arith.constant 0 : i32
    %c0_i32_0 = arith.constant 0 : i32
    %c0_i32_1 = arith.constant 0 : i32
    return %c0_i32, %c0_i32_0 : i32, i32
  }
  func.func @transform_5(%arg0: i32) -> (i32, i32, i32) {
    %c0_i32 = arith.constant 0 : i32
    %c0_i32_0 = arith.constant 0 : i32
    %c0_i32_1 = arith.constant 0 : i32
    return %arg0, %c0_i32, %c0_i32_0 : i32, i32, i32
  }
}

</mosaic_0001>

<bundles_post_ra>
// kernel: double_conv_forward_folded.1
= control target key start
LH: loop header
LB: loop body
LE: loop exit
PB: predicated region body
PF: predicated region fallthrough
CT: control target
= control target key end

     0   :  { %10 = vsyncpa [#allocation3], 0  ;;  %s1460_s0 = inlined_call_operand.hbm [shape: f32[2,16,64], index: 0, kind: input, shape index: {}]   ;;  %s1461_s1 = inlined_call_operand.hbm [shape: bf16[64,384], index: 1, kind: input, shape index: {}]   ;;  %s1462_s2 = inlined_call_operand.vmem [shape: f32[1,128], index: 2, kind: input, shape index: {}]   ;;  %s1463_s3 = inlined_call_operand.hbm [shape: bf16[128,384], index: 3, kind: input, shape index: {}]   ;;  %s1464_s4 = inlined_call_operand.vmem [shape: f32[1,128], index: 4, kind: input, shape index: {}]   ;;  %s1465_s5 = inlined_call_operand.hbm [shape: f32[2,16,128], index: 5, kind: output, shape index: {}]  }
   0x1   :  { %12 = vsyncpa [#allocation3 + $0x1], 0 }
   0x2   :  { %13 = vsyncpa [#allocation6], 0 }
   0x3   :  { %14 = vsyncpa [#allocation4], 0 }
   0x4   :  { %16 = vsyncpa [#allocation4 + $0x1], 0  ;;  %s1292_s18 = smov 0   ;;  %s1294_s19 = smov 0  }
   0x5   :  { %s1296_s20 = smov 0   ;;  %s1298_s21 = smov 0  }
   0x6 LB: > { %s1313_s22 = sadd.s32 4294967295, %s1251_s21   ;;  %s808_s23 = sadd.s32 4294967294, %s1251_s21   ;;  %s1251_s21 = sphi %s1298_s21, %s1475_s21   ;;  %s1247_s20 = sphi %s1296_s20, %s1474_s20   ;;  %s1243_s19 = sphi %s1294_s19, %s1473_s19   ;;  %s1239_s18 = sphi %s1292_s18, %s1472_s18  }
   0x7   : > { %p42_p0 = scmp.ne.s32.totalorder %s1243_s19, %s1239_s18  ;;  %p43_p1 = scmp.eq.s32.totalorder %s1313_s22, 0 }
   0x8   : > { %p150_p2 = scmp.eq.s32.totalorder %s1313_s22, 1  ;;  %p156_p3 = scmp.eq.s32.totalorder %s808_s23, 1 }
   0x9   : > { %p1322_p4 = por %p43_p1, %p42_p0  ;;  %p809_p5 = scmp.ge.s32.totalorder %s1251_s21, 1 }
   0xa   : > { %p1327_p6 = por %p156_p3, %p42_p0  ;;  %p163_p7 = scmp.lt.s32.totalorder %s1251_s21, 3 }
   0xb   : > { %s174_s28 = sshll.u32 %s1461_s1, 4  ;;  %s1253_s30 = smov [#allocation5]   ;;  %s175_s28 = int_to_ptr.hbm [resolvable:$true] %s174_s28 }
   0xc   : > { %p1335_p8 = pnand %p809_p5, %p163_p7  ;;  %s176_s6 = sshll.u32 %s1253_s30, 4  ;;  %s177_s6 = int_to_ptr.vmem [resolvable:$true] %s176_s6 }
   0xd   : > { %s191_s9 = sshll.u32 %s1463_s3, 4  ;;  %s1254_s10 = smov 192   ;;  %s192_s9 = int_to_ptr.hbm [resolvable:$true] %s191_s9 }
   0xe   : > { %p1027_p9 = pneg %p1335_p8  ;;  %s1255_s11 = smov 12  }
   0xf   : > { %s1256_s12 = smov [#allocation7]   ;;  %s1348_s14 = sadd.s32 1, %s1251_s21  }
  0x10   : > { %p1028_p10 = pnand %p1027_p9, %p43_p1  ;;  %s193_s13 = sshll.u32 %s1256_s12, 4  ;;  %s194_s13 = int_to_ptr.vmem [resolvable:$true] %s193_s13 }
  0x11   : > { %s29_s15 = sadd.s32 1, %s1247_s20  ;;  %s26_s16 = ssub.s32 %s1251_s21, %s1348_s14 }
  0x12   : > { %1030 = dma.hbm_to_vmem [thread:$0]  (!%p1028_p10), %s175_s28, 1536, %s177_s6, [#allocation6], %s1254_s10, %s1254_s10, %s1255_s11  }
  0x13   : > { %1033 = dma.hbm_to_vmem [thread:$0]  (!%p1028_p10), %s192_s9, 3072, %s194_s13, [#allocation6], %s1254_s10, %s1254_s10, %s1255_s11  }
  0x14   : > { %p36_p12 = scmp.ne.s32.totalorder %s1247_s20, %s1243_s19  ;;  %p27_p13 = scmp.eq.s32.totalorder %s26_s16, 0 }
  0x15   : > { %p37_p0 = scmp.eq.s32.totalorder %s1251_s21, 0  ;;  %p1044_p5 = scmp.lt.s32.totalorder %s1251_s21, 2 }
  0x16   : > { %p1358_p3 = por %p150_p2, %p36_p12  ;;  %s210_s26 = sand.u32 1, %s1247_s20  }
  0x17   : > { %s1364_s23 = scalar_select %p27_p13, %s1247_s20, %s29_s15  }
  0x18   : > { %p38_p7 = por %p37_p0, %p36_p12  ;;  %s813_s27 = sshll.u32 %s210_s26, 4 }
  0x19   : > { %s977_s28 = sshll.u32 %s1251_s21, 4  ;;  %s214_s8 = scalar_lea.vmem [#allocation2], %s813_s27 }
  0x1a   : > { %s219_s7 = scalar_lea.hbm %s1460_s0, %s977_s28  ;;  %s222_s9 = sshll.u32 %s214_s8, 4  ;;  %s223_s9 = int_to_ptr.vmem [resolvable:$true] %s222_s9 }
  0x1b   : > { %s220_s10 = sshll.u32 %s219_s7, 4  ;;  %p1371_p2 = pnand %p1044_p5, %p38_p7  ;;  %s221_s10 = int_to_ptr.hbm [resolvable:$true] %s220_s10 }
  0x1c   : > { %s211_s12 = scalar_lea.sflag [#allocation3], %s210_s26  ;;  %s1151_s13 = sshra.s32 %s221_s10, 4  ;;  %s1152_s13 = int_to_ptr.hbm [resolvable:$true] %s1151_s13 }
  0x1d   : > { %s1153_s15 = scalar_lea.hbm %s1152_s13, 16  ;;  %p1155_p10 = pneg %p1371_p2 }
  0x1e   : > { %p1154_p9 = scmp.ne.s32.totalorder %s1152_s13, %s1153_s15  ;;  %s1158_s28 = scalar_lea.hbm %s1460_s0, 32 }
  0x1f   : > { %p1159_p0 = scmp.lt.s32.totalorder %s1152_s13, %s1460_s0  ;;  %p1160_p5 = scmp.lt.s32.totalorder %s1158_s28, %s1153_s15 }
  0x20   : > { %p1156_p12 = pnand %p1155_p10, %p1154_p9 }
  0x21   : > { %p1161_p7 = por %p1160_p5, %p1159_p0 }
  0x22   : > { %p1157_p13 = pneg %p1156_p12 }
  0x24   : > { %p1162_p11 = pnand %p1161_p7, %p1157_p13 }
  0x26   : > { %1165 = shalt.err (!%p1162_p11)
}
  0x27   : > { %s1257_s26 = smov 128   ;;  %s1258_s7 = smov 8  }
  0x28   : > { %1037 = dma.hbm_to_vmem [thread:$0]  (!%p1371_p2), %s221_s10, 256, %s223_s9, %s211_s12, %s1257_s26, %s1257_s26, %s1258_s7  }
  0x29   : > { %234 = sbr.rel (%p1335_p8) target bundleno = 395 (0x18b), region = 40  ;;  %s1388_s8 = sand.u32 (!%p1335_p8), 1, %s1243_s19  }
  0x2a   : > { %s817_s13 = sshll.u32 (!%p1335_p8), %s1388_s8, 4  ;;  %s237_s15 = scalar_lea.sflag (!%p1335_p8), [#allocation3], %s1388_s8 }
  0x2b   : > { %s1394_s16 = scalar_lea.vmem (!%p1335_p8), [#allocation2], %s817_s13 }
  0x2e   : > { %1226 = dma.done.wait (%p1322_p4), %s237_s15, 256  }
  0x2f   : > { %1228 = vsyncadd (%p1322_p4), %s237_s15, 4294967040 }
  0x30   : > { %1230 = dma.done.wait (%p43_p1), [#allocation6], 4608  }
  0x31   : > { %1232 = vsyncadd (%p43_p1), [#allocation6], 4294962688  ;;  %v861_v0 = vld [vmem:[#allocation5 + $0x48] sm:$0xf]  ;;  %v988_v1 = vld [vmem:[#allocation5 + $0x50] sm:$0xf0] }
  0x32   : > { %v849_v2 = vld [vmem:[#allocation5 + $0x30] sm:$0xf]  ;;  %v862_v3 = vor.u32 %v988_v1, %v861_v0  ;;  %v985_v4 = vld [vmem:[#allocation5 + $0x38] sm:$0xf0]  ;;  %v987_v5 = vld [vmem:[#allocation5 + $0x4c] sm:$0xf] }
  0x33   : > { %v863_v6 = vld [vmem:[#allocation5 + $0x54] sm:$0xf0]  ;;  %v850_v7 = vor.u32 %v985_v4, %v849_v2  ;;  %v984_v9 = vld [vmem:[#allocation5 + $0x34] sm:$0xf]  ;;  %v851_v10 = vld [vmem:[#allocation5 + $0x3c] sm:$0xf0] }
  0x34   : > { %385 = vmatpush.bf16.msra.mxu2 %v862_v3  ;;  %v866_v8 = vor.u32 %v987_v5, %v863_v6  ;;  %v837_v11 = vld [vmem:[#allocation5 + $0x18] sm:$0xf]  ;;  %v982_v12 = vld [vmem:[#allocation5 + $0x20] sm:$0xf0]  ;;  %v854_v13 = vor.u32 %v984_v9, %v851_v10  ;;  %v981_v14 = vld [vmem:[#allocation5 + $0x1c] sm:$0xf] }
  0x35   : > { %v839_v15 = vld [vmem:[#allocation5 + $0x24] sm:$0xf0]  ;;  %v838_v16 = vor.u32 %v982_v12, %v837_v11  ;;  %v825_v17 = vld [vmem:[#allocation5] sm:$0xf]  ;;  %v979_v18 = vld [vmem:[#allocation5 + $0x8] sm:$0xf0] }
  0x36   : > { %399 = vmatpush.bf16.msra.mxu1 %v866_v8  ;;  %v869_v19 = vld [vmem:[#allocation5 + $0x50] sm:$0xf]  ;;  %v989_v20 = vld [vmem:[#allocation5 + $0x58] sm:$0xf0]  ;;  %v842_v21 = vor.u32 %v981_v14, %v839_v15  ;;  %v978_v22 = vld [vmem:[#allocation5 + $0x4] sm:$0xf]  ;;  %v826_v24 = vor.u32 %v979_v18, %v825_v17 }
  0x37   : > { %v827_v23 = vld [vmem:[#allocation5 + $0xc] sm:$0xf0]  ;;  %v280_v26 = vld [vmem:[%s1394_s16 + $0x8] sm:$0xff]  ;;  %v870_v27 = vor.u32 %v989_v20, %v869_v19  ;;  %v986_v29 = vld [vmem:[#allocation5 + $0x40] sm:$0xf0]  ;;  %vm377_vm0 = vcmask 523264  }
  0x38   : > { %386 = vmatpush.bf16.msra.mxu2 %v850_v7  ;;  %v279_v25 = vld [vmem:[%s1394_s16] sm:$0xff]  ;;  %v857_v28 = vld [vmem:[#allocation5 + $0x38] sm:$0xf]  ;;  %v830_v30 = vor.u32 %v978_v22, %v827_v23  ;;  %v983_v34 = vld [vmem:[#allocation5 + $0x28] sm:$0xf0]  ;;  %s1014_s9 = sshll.u32 %s1313_s22, 4 }
  0x39   : > { %v296_v31 = vpack.c.bf16 %v280_v26, %v279_v25  ;;  %v858_v32 = vor.u32 %v986_v29, %v857_v28  ;;  %v845_v33 = vld [vmem:[#allocation5 + $0x20] sm:$0xf]  ;;  %v833_v36 = vld [vmem:[#allocation5 + $0x8] sm:$0xf]  ;;  %v980_v37 = vld [vmem:[#allocation5 + $0x10] sm:$0xf0]  ;;  %s712_s28 = scalar_lea.hbm %s1465_s5, %s1014_s9 }
  0x3a   : > { %400 = vmatpush.bf16.msra.mxu1 %v854_v13  ;;  %v846_v35 = vor.u32 %v983_v34, %v845_v33  ;;  %v834_v38 = vor.u32 %v980_v37, %v833_v36  ;;  %v962_v39 = vld [vmem:[#allocation7 + $0xa8] sm:$0xf]  ;;  %v1012_v40 = vld [vmem:[#allocation7 + $0xb0] sm:$0xf0]  ;;  %v1011_v41 = vld [vmem:[#allocation7 + $0xac] sm:$0xf] }
  0x3b   : > { %v963_v42 = vor.u32 %v1012_v40, %v962_v39  ;;  %v964_v43 = vld [vmem:[#allocation7 + $0xb4] sm:$0xf0]  ;;  %v970_v44 = vld [vmem:[#allocation7 + $0xb0] sm:$0xf]  ;;  %v1013_v45 = vld [vmem:[#allocation7 + $0xb8] sm:$0xf0] }
  0x3c   : > { %387 = vmatpush.bf16.msra.mxu2 %v838_v16  ;;  %v967_v46 = vor.u32 %v1011_v41, %v964_v43  ;;  %v971_v47 = vor.u32 %v1013_v45, %v970_v44  ;;  %v950_v48 = vld [vmem:[#allocation7 + $0x90] sm:$0xf]  ;;  %v1009_v49 = vld [vmem:[#allocation7 + $0x98] sm:$0xf0]  ;;  %v1008_v51 = vld [vmem:[#allocation7 + $0x94] sm:$0xf] }
  0x3d   : > { %626 = vmatpush.bf16.msra.mxu3 %v963_v42  ;;  %v951_v50 = vor.u32 %v1009_v49, %v950_v48  ;;  %v952_v52 = vld [vmem:[#allocation7 + $0x9c] sm:$0xf0]  ;;  %v958_v54 = vld [vmem:[#allocation7 + $0x98] sm:$0xf]  ;;  %v1010_v55 = vld [vmem:[#allocation7 + $0xa0] sm:$0xf0]  ;;  %v281_v49 = vlaneseq }
  0x3e   : > { %401 = vmatpush.bf16.msra.mxu1 %v842_v21  ;;  %640 = vmatpush.bf16.msra.mxu0 %v967_v46  ;;  %v955_v53 = vor.u32 %v1008_v51, %v952_v52  ;;  %v959_v56 = vor.u32 %v1010_v55, %v958_v54  ;;  %v938_v57 = vld [vmem:[#allocation7 + $0x78] sm:$0xf]  ;;  %v1006_v58 = vld [vmem:[#allocation7 + $0x80] sm:$0xf0]  ;;  %v1005_v59 = vld [vmem:[#allocation7 + $0x7c] sm:$0xf] }
  0x3f   : > { %v939_v60 = vor.u32 %v1006_v58, %v938_v57  ;;  %v940_v61 = vld [vmem:[#allocation7 + $0x84] sm:$0xf0]  ;;  %v946_v62 = vld [vmem:[#allocation7 + $0x80] sm:$0xf]  ;;  %v1007_v63 = vld [vmem:[#allocation7 + $0x88] sm:$0xf0] }
  0x40   : > { %388 = vmatpush.bf16.msra.mxu2 %v826_v24  ;;  %v943_v0 = vor.u32 %v1005_v59, %v940_v61  ;;  %v947_v1 = vor.u32 %v1007_v63, %v946_v62  ;;  %v926_v2 = vld [vmem:[#allocation7 + $0x60] sm:$0xf]  ;;  %v1003_v3 = vld [vmem:[#allocation7 + $0x68] sm:$0xf0]  ;;  %v1002_v4 = vld [vmem:[#allocation7 + $0x64] sm:$0xf] }
  0x41   : > { %627 = vmatpush.bf16.msra.mxu3 %v951_v50  ;;  %v927_v5 = vor.u32 %v1003_v3, %v926_v2  ;;  %v928_v6 = vld [vmem:[#allocation7 + $0x6c] sm:$0xf0]  ;;  %v934_v7 = vld [vmem:[#allocation7 + $0x68] sm:$0xf]  ;;  %v1004_v8 = vld [vmem:[#allocation7 + $0x70] sm:$0xf0] }
  0x42   : > { %402 = vmatpush.bf16.msra.mxu1 %v830_v30  ;;  %641 = vmatpush.bf16.msra.mxu0 %v955_v53  ;;  %v931_v9 = vor.u32 %v1002_v4, %v928_v6  ;;  %v935_v10 = vor.u32 %v1004_v8, %v934_v7  ;;  %v914_v11 = vld [vmem:[#allocation7 + $0x48] sm:$0xf]  ;;  %v1000_v12 = vld [vmem:[#allocation7 + $0x50] sm:$0xf0]  ;;  %v999_v14 = vld [vmem:[#allocation7 + $0x4c] sm:$0xf] }
  0x43   : > { %871 = vmatmul.msk.bf16.vlgmr.msra.gmra.mxu2 %vm377_vm0, %v296_v31  ;;  %v915_v13 = vor.u32 %v1000_v12, %v914_v11  ;;  %v916_v15 = vld [vmem:[#allocation7 + $0x54] sm:$0xf0]  ;;  %v922_v17 = vld [vmem:[#allocation7 + $0x50] sm:$0xf]  ;;  %v1001_v18 = vld [vmem:[#allocation7 + $0x58] sm:$0xf0] }
  0x44   : > { %413 = vmatpush.bf16.msrb.mxu2 %v870_v27  ;;  %v919_v16 = vor.u32 %v999_v14, %v916_v15  ;;  %v923_v19 = vor.u32 %v1001_v18, %v922_v17  ;;  %v902_v20 = vld [vmem:[#allocation7 + $0x30] sm:$0xf]  ;;  %v997_v21 = vld [vmem:[#allocation7 + $0x38] sm:$0xf0]  ;;  %v996_v23 = vld [vmem:[#allocation7 + $0x34] sm:$0xf] }
  0x45   : > { %872 = vmatmul.msk.bf16.vlgmr.msra.gmra.mxu1 %vm377_vm0, %v296_v31  ;;  %628 = vmatpush.bf16.msra.mxu3 %v939_v60  ;;  %v903_v22 = vor.u32 %v997_v21, %v902_v20  ;;  %v904_v24 = vld [vmem:[#allocation7 + $0x3c] sm:$0xf0]  ;;  %v910_v25 = vld [vmem:[#allocation7 + $0x38] sm:$0xf]  ;;  %v998_v27 = vld [vmem:[#allocation7 + $0x40] sm:$0xf0] }
  0x46   : > { %654 = vmatpush.bf16.msrb.mxu1 %v971_v47  ;;  %642 = vmatpush.bf16.msra.mxu0 %v943_v0  ;;  %v907_v26 = vor.u32 %v996_v23, %v904_v24  ;;  %v911_v28 = vor.u32 %v998_v27, %v910_v25  ;;  %v890_v29 = vld [vmem:[#allocation7 + $0x18] sm:$0xf]  ;;  %v994_v30 = vld [vmem:[#allocation7 + $0x20] sm:$0xf0]  ;;  %v892_v33 = vld [vmem:[#allocation7 + $0x24] sm:$0xf0] }
  0x47   : > { %v898_v34 = vld [vmem:[#allocation7 + $0x20] sm:$0xf]  ;;  %v991_v40 = vld [vmem:[#allocation7 + $0x8] sm:$0xf0]  ;;  %v990_v41 = vld [vmem:[#allocation7 + $0x4] sm:$0xf] }
  0x48   : > { %414 = vmatpush.bf16.msrb.mxu2 %v858_v32  ;;  %v891_v32 = vor.u32 %v994_v30, %v890_v29  ;;  %v878_v39 = vld [vmem:[#allocation7] sm:$0xf]  ;;  %v880_v43 = vld [vmem:[#allocation7 + $0xc] sm:$0xf0]  ;;  %v886_v44 = vld [vmem:[#allocation7 + $0x8] sm:$0xf] }
  0x49   : > { %629 = vmatpush.bf16.msra.mxu3 %v927_v5  ;;  %v879_v42 = vor.u32 %v991_v40, %v878_v39  ;;  %v883_v45 = vor.u32 %v990_v41, %v880_v43  ;;  %v992_v46 = vld [vmem:[#allocation7 + $0x10] sm:$0xf0]  ;;  %v1406_v50 = vshrl.u32 %v281_v49, 7  ;;  %v1089_v3 = vld [vmem:[%s1462_s2] ss:$0 sm:$0xff]  ;;  %s277_s22 = scalar_lea.vmem [#allocation8], %s817_s13 }
  0x4a   : > { %655 = vmatpush.bf16.msrb.mxu1 %v959_v56  ;;  %643 = vmatpush.bf16.msra.mxu0 %v931_v9  ;;  %v887_v47 = vor.u32 %v992_v46, %v886_v44  ;;  %v1259_v56 = vmov 0.0   ;;  %s713_s30 = sshll.u32 %s277_s22, 4  ;;  %s715_s6 = sshll.u32 %s712_s28, 4  ;;  %s714_s30 = int_to_ptr.vmem [resolvable:$true] %s713_s30  ;;  %s716_s6 = int_to_ptr.hbm [resolvable:$true] %s715_s6 }
  0x4b   : > { %vm284_vm1 = vcmp.ge.s32.totalorder %v1406_v50, 2  ;;  %vm425_vm2 = vcmp.lt.s32.totalorder %v1406_v50, 2  ;;  %v283_v55 = vadd.s32 8, %v1406_v50  ;;  %vm430_vm4 = vcmp.lt.s32.totalorder %v1406_v50, 6  ;;  %s701_s26 = scalar_lea.sflag [#allocation4], %s1388_s8  ;;  %s1195_s7 = sshra.s32 %s716_s6, 4  ;;  %s1196_s7 = int_to_ptr.hbm [resolvable:$true] %s1195_s7 }
  0x4c   : > { %415 = vmatpush.bf16.msrb.mxu2 %v846_v35  ;;  %v995_v35 = vld [vmem:[#allocation7 + $0x28] sm:$0xf0]  ;;  %v821_v57 = vsel %vm284_vm1, 1.0, %v1259_v56  ;;  %vm675_vm8 = vcmp.lt.s32.totalorder %v1406_v50, 7  ;;  %vm453_vm9 = vcmp.ge.s32.totalorder %v1406_v50, 1  ;;  %vm670_vm10 = vcmp.lt.s32.totalorder %v1406_v50, 1  ;;  %p1202_p11 = scmp.lt.s32.totalorder %s1196_s7, %s1465_s5 }
  0x4d   : > { %630 = vmatpush.bf16.msra.mxu3 %v915_v13  ;;  %v899_v37 = vor.u32 %v995_v35, %v898_v34  ;;  %vm291_vm3 = vcmp.lt.s32.totalorder %v283_v55, 14  ;;  %vm460_vm7 = vcmp.lt.s32.totalorder %v283_v55, 15  ;;  %v874_v27 = vsel %vm453_vm9, 1.0, %v1259_v56  ;;  %v1090_v35 = vld [vmem:[%s1464_s4] ss:$0 sm:$0xff]  ;;  %s1197_s15 = scalar_lea.hbm %s1196_s7, 16 }
  0x4e   : > { %656 = vmatpush.bf16.msrb.mxu1 %v947_v1  ;;  %644 = vmatpush.bf16.msra.mxu0 %v919_v16  ;;  %v822_v0 = vsel %vm291_vm3, 1.0, %v1259_v56  ;;  %v875_v23 = vsel %vm460_vm7, 1.0, %v1259_v56  ;;  %p1198_p1 = scmp.ne.s32.totalorder %s1196_s7, %s1197_s15  ;;  %s1201_s24 = scalar_lea.hbm %s1465_s5, 32 }
  0x4f   : > { %p1203_p2 = scmp.lt.s32.totalorder %s1201_s24, %s1197_s15 }
  0x50   : > { %416 = vmatpush.bf16.msrb.mxu2 %v834_v38  ;;  %p1199_p4 = pnand %p1198_p1, %p1358_p3 }
  0x51   : > { %631 = vmatpush.bf16.msra.mxu3 %v903_v22  ;;  %p1204_p9 = por %p1203_p2, %p1202_p11 }
  0x52   : > { %657 = vmatpush.bf16.msrb.mxu1 %v935_v10  ;;  %645 = vmatpush.bf16.msra.mxu0 %v907_v26  ;;  %p1200_p8 = pneg %p1199_p4 }
  0x53   : > { %873 = vmatmul.msk.bf16.vlgmr.msrb.gmra.mxu2 %vm377_vm0, %v296_v31  ;;  %v993_v31 = vld [vmem:[#allocation7 + $0x1c] sm:$0xf] }
  0x54   : > { %v895_v36 = vor.u32 %v993_v31, %v892_v33  ;;  %p1205_p10 = pnand %p1204_p9, %p1200_p8 }
  0x55   : > { %632 = vmatpush.bf16.msra.mxu3 %v891_v32 }
  0x56   : > { %658 = vmatpush.bf16.msrb.mxu1 %v923_v19  ;;  %646 = vmatpush.bf16.msra.mxu0 %v895_v36 }
  0x59   : > { %633 = vmatpush.bf16.msra.mxu3 %v879_v42 }
  0x5a   : > { %659 = vmatpush.bf16.msrb.mxu1 %v911_v28  ;;  %647 = vmatpush.bf16.msra.mxu0 %v883_v45 }
  0x5e   : > { %660 = vmatpush.bf16.msrb.mxu1 %v899_v37 }
  0x62   : > { %661 = vmatpush.bf16.msrb.mxu1 %v887_v47 }
  0xc2   : > { %v404_v51 = vpop.f32.mrf.mxu1 }
  0xc6   : > { %v390_v38 = vpop.f32.mrf.mxu2 }
  0xc7   : > { %v423_v54 = vrot.slane %v390_v38, 6 }
  0xca   : > { %v406_v61 = vpop.f32.mrf.mxu1 }
  0xce   : > { %v392_v48 = vpop.f32.mrf.mxu2 }
  0xcf   : > { %v424_v52 = vrot.slane %v392_v48, 6 }
  0xd1   : > { %v427_v58 = vsel %vm425_vm2, %v424_v52, %v423_v54  ;;  %v426_v62 = vsel %vm425_vm2, %v423_v54, %v424_v52 }
  0xd2   : > { %v433_v59 = vmul.f32 %v821_v57, %v427_v58  ;;  %v436_v6 = vadd.f32 %v426_v62, %v406_v61 }
  0xd4   : > { %v435_v2 = vadd.f32 %v433_v59, %v404_v51 }
  0xd6   : > { %v418_v53 = vpop.f32.mrf.mxu2 }
  0xd7   : > { %v428_v63 = vrot.slane %v418_v53, 2 }
  0xde   : > { %v420_v60 = vpop.f32.mrf.mxu2 }
  0xdf   : > { %v429_v1 = vrot.slane %v420_v60, 2 }
  0xe1   : > { %v431_v4 = vsel %vm430_vm4, %v428_v63, %v429_v1  ;;  %v432_v5 = vsel %vm430_vm4, %v429_v1, %v428_v63 }
  0xe2   : > { %v438_v7 = vmul.f32 %v822_v0, %v432_v5  ;;  %v439_v8 = vadd.f32 %v435_v2, %v431_v4 }
  0xe4   : > { %v440_v9 = vadd.f32 %v438_v7, %v436_v6  ;;  %v445_v10 = vadd.f32 %v1089_v3, %v439_v8 }
  0xe6   : > { %v446_v11 = vadd.f32 %v1089_v3, %v440_v9  ;;  %v449_v12 = vmul.f32 0.01, %v445_v10  ;;  %vm447_vm5 = vcmp.ge.f32.partialorder %v445_v10, 0.0 }
  0xe8   : > { %vm448_vm6 = vcmp.ge.f32.partialorder %v446_v11, 0.0  ;;  %v450_v13 = vmul.f32 0.01, %v446_v11  ;;  %v451_v14 = vsel %vm447_vm5, %v445_v10, %v449_v12 }
  0xea   : > { %v452_v15 = vsel %vm448_vm6, %v446_v11, %v450_v13 }
  0xeb   : > { %v465_v16 = vpack.c.bf16 %v452_v15, %v451_v14 }
  0xed   : > { %634 = vmatmul.bf16.vlgmr.msra.gmra.mxu3 %v465_v16  ;;  %648 = vmatmul.bf16.vlgmr.msra.gmra.mxu0 %v465_v16 }
  0xee   : > { %662 = vmatmul.bf16.vlgmr.msrb.gmra.mxu1 %v465_v16 }
 0x16a   : > { %v649_v19 = vpop.f32.mrf.mxu0 }
 0x16b   : > { %v663_v17 = vpop.f32.mrf.mxu1 }
 0x16c   : > { %v673_v22 = vrot.slane %v663_v17, 1 }
 0x170   : > { %v635_v18 = vpop.f32.mrf.mxu3 }
 0x171   : > { %v668_v25 = vrot.slane %v635_v18, 7 }
 0x172   : > { %v651_v29 = vpop.f32.mrf.mxu0 }
 0x173   : > { %v665_v20 = vpop.f32.mrf.mxu1 }
 0x174   : > { %v674_v21 = vrot.slane %v665_v20, 1 }
 0x176   : > { %v677_v26 = vsel %vm675_vm8, %v674_v21, %v673_v22  ;;  %v676_v38 = vsel %vm675_vm8, %v673_v22, %v674_v21 }
 0x177   : > { %v683_v32 = vmul.f32 %v875_v23, %v677_v26 }
 0x178   : > { %v637_v24 = vpop.f32.mrf.mxu3 }
 0x179   : > { %v669_v28 = vrot.slane %v637_v24, 7 }
 0x17b   : > { %v671_v30 = vsel %vm670_vm10, %v668_v25, %v669_v28  ;;  %v672_v31 = vsel %vm670_vm10, %v669_v28, %v668_v25 }
 0x17c   : > { %v678_v33 = vmul.f32 %v874_v27, %v672_v31  ;;  %v681_v34 = vadd.f32 %v671_v30, %v651_v29 }
 0x17e   : > { %v680_v36 = vadd.f32 %v678_v33, %v649_v19  ;;  %v685_v37 = vadd.f32 %v683_v32, %v681_v34 }
 0x180   : > { %v684_v39 = vadd.f32 %v680_v36, %v676_v38  ;;  %v691_v40 = vadd.f32 %v1090_v35, %v685_v37 }
 0x182   : > { %v690_v41 = vadd.f32 %v1090_v35, %v684_v39  ;;  %vm693_vm11 = vcmp.ge.f32.partialorder %v691_v40, 0.0  ;;  %v695_v42 = vmul.f32 0.01, %v691_v40 }
 0x184   : > { %vm692_vm12 = vcmp.ge.f32.partialorder %v690_v41, 0.0  ;;  %v694_v43 = vmul.f32 0.01, %v690_v41  ;;  %v697_v44 = vsel %vm693_vm11, %v691_v40, %v695_v42 }
 0x185   : > { %699 = vst [vmem:[%s277_s22 + $0x8] sm:$0xff] %v697_v44 }
 0x186   : > { %v696_v45 = vsel %vm692_vm12, %v690_v41, %v694_v43 }
 0x187   : > { %698 = vst [vmem:[%s277_s22] sm:$0xff] %v696_v45 }
 0x188   : > { %1208 = shalt.err (!%p1205_p10)
}
 0x189   : > { %s1260_s8 = smov 128   ;;  %s1261_s10 = smov 8  }
 0x18a   : > { %1025 = dma.vmem_to_hbm [thread:$0]  (%p1358_p3), %s714_s30, 256, %s716_s6, %s701_s26, %s1260_s8, %s1260_s8, %s1261_s10  }
 0x18b PF: > { %s730_s11 = sand.u32 1, %s1239_s18   ;;  %p1471_p12 = scmp.ge.s32.totalorder %s1251_s21, 2 }
 0x18c   : > { %s731_s12 = scalar_lea.sflag [#allocation4], %s730_s11 }
 0x18d   : > { %p1039_p13 = pnand %p1471_p12, %p1327_p6 }
 0x18f   : > { %p1040_p0 = pneg %p1039_p13 }
 0x191   : > { %1234 = dma.done.wait (%p1040_p0), %s731_s12, 256  }
 0x192   : > { %1236 = vsyncadd (%p1040_p0), %s731_s12, 4294967040  ;;  %p19_p5 = scmp.ge.s32.totalorder %s1348_s14, 4   ;;  %s1472_s18 = smov %s1243_s19 }
 0x193   : > { %s1473_s19 = smov %s1247_s20  ;;  %s1474_s20 = smov %s1364_s23 }
 0x194   : > { %s1475_s21 = smov %s1348_s14  ;;  %21 = sbr.rel (!%p19_p5) target bundleno = 6 (0x6), region = 93 }
 0x199   :  { %737 = vsyncpa [#allocation3], 1 }
 0x19a   :  { %739 = vsyncpa [#allocation3 + $0x1], 1 }
 0x19b   :  { %740 = vsyncpa [#allocation6], 1 }
 0x19c   :  { %741 = vsyncpa [#allocation4], 1 }
 0x19d   :  { %743 = vsyncpa [#allocation4 + $0x1], 1 }

</bundles_post_ra>
